<compile_context>
chip_gen: v7x
topology: tpu7x:2x2x1
jax: 0.10.0
libtpu: 0.0.40
codegen_flags: <defaults>
</compile_context>

<pallas_src>
import jax
import jax.numpy as jnp
from jax.experimental import pallas as pl
from jax.experimental.pallas import tpu as pltpu

STATE_SIZE = 64
ACTION_SIZE = 7
HIDDEN = 64
PADDED_OUT = 128          # lane-dense output width (last layer zero-padded 7 -> 128)
DEFAULT_TILE_B = 512      # multiple of 256 (v6e/v7x MXU) and 128 (v5e MXU)


def qnetwork_kernel(x_ref, w1_ref, b1_ref, w2_ref, b2_ref,
                    w3_ref, b3_ref, w4_ref, b4_ref, o_ref):
    # x / weights are bf16; accumulate in f32 on the MXU, bias/ReLU in f32 on the VPU.
    x = x_ref[...]                                                        # (tb, 64) bf16
    h = jnp.dot(x, w1_ref[...], preferred_element_type=jnp.float32) + b1_ref[...]
    h = jnp.maximum(h, 0.0).astype(jnp.bfloat16)
    h = jnp.dot(h, w2_ref[...], preferred_element_type=jnp.float32) + b2_ref[...]
    h = jnp.maximum(h, 0.0).astype(jnp.bfloat16)
    h = jnp.dot(h, w3_ref[...], preferred_element_type=jnp.float32) + b3_ref[...]
    h = jnp.maximum(h, 0.0).astype(jnp.bfloat16)
    out = jnp.dot(h, w4_ref[...], preferred_element_type=jnp.float32) + b4_ref[...]
    o_ref[...] = out.astype(o_ref.dtype)                                  # (tb, 128) f32


def qnetwork_forward(x, params, *, tile_b=DEFAULT_TILE_B):
    """x: (B, STATE_SIZE) float32 -> (B, ACTION_SIZE) float32."""
    B = x.shape[0]

    # Batch tile: one 8-aligned block for small batches, tile_b rows otherwise.
    if B <= tile_b:
        tb = max(8, ((B + 7) // 8) * 8)
    else:
        tb = tile_b
    padded_b = pl.cdiv(B, tb) * tb

    xp = x.astype(jnp.bfloat16)
    if padded_b != B:
        xp = jnp.pad(xp, ((0, padded_b - B), (0, 0)))

    grid = (padded_b // tb,)

    def resident(shape):  # weights/biases: same block every step -> DMA'd once
        return pl.BlockSpec(shape, lambda i: (0, 0))

    in_specs = [
        pl.BlockSpec((tb, STATE_SIZE), lambda i: (i, 0)),   # x tile (pipelined)
        resident((STATE_SIZE, HIDDEN)),                     # w1
        resident((1, HIDDEN)),                              # b1
        resident((HIDDEN, HIDDEN)),                         # w2
        resident((1, HIDDEN)),                              # b2
        resident((HIDDEN, HIDDEN)),                         # w3
        resident((1, HIDDEN)),                              # b3
        resident((HIDDEN, PADDED_OUT)),                     # w4 (zero-padded)
        resident((1, PADDED_OUT)),                          # b4 (zero-padded)
    ]
    out_spec = pl.BlockSpec((tb, PADDED_OUT), lambda i: (i, 0))

    flops = 2 * padded_b * (STATE_SIZE * HIDDEN + HIDDEN * HIDDEN * 2
                            + HIDDEN * PADDED_OUT)
    weight_bytes = (2 * (STATE_SIZE * HIDDEN + 2 * HIDDEN * HIDDEN
                         + HIDDEN * PADDED_OUT)
                    + 4 * (3 * HIDDEN + PADDED_OUT))
    bytes_accessed = padded_b * STATE_SIZE * 2 + padded_b * PADDED_OUT * 4 + weight_bytes

    out_padded = pl.pallas_call(
        qnetwork_kernel,
        out_shape=jax.ShapeDtypeStruct((padded_b, PADDED_OUT), jnp.float32),
        grid=grid,
        in_specs=in_specs,
        out_specs=out_spec,
        compiler_params=pltpu.CompilerParams(
            dimension_semantics=("parallel",)),
        cost_estimate=pl.CostEstimate(
            flops=flops, transcendentals=0, bytes_accessed=bytes_accessed),
    )(xp,
      params["w1"], params["b1"],
      params["w2"], params["b2"],
      params["w3"], params["b3"],
      params["w4"], params["b4"])

    # Drop the batch padding and the zero lanes of the padded last layer.
    return out_padded[:B, :ACTION_SIZE]


def init_params(key):
    """Deterministic init mirroring nn.Linear shapes.

    Weights stored transposed (in, out) in bf16; biases (1, out) in f32.
    Last layer zero-padded 7 -> 128 lanes (padded columns are exactly zero).
    """
    ks = jax.random.split(key, 8)

    def linear(kw, kb, fan_in, fan_out):
        bound = 1.0 / jnp.sqrt(jnp.float32(fan_in))   # PyTorch default U(-1/sqrt(in), .)
        w = jax.random.uniform(kw, (fan_in, fan_out), jnp.float32, -bound, bound)
        b = jax.random.uniform(kb, (1, fan_out), jnp.float32, -bound, bound)
        return w.astype(jnp.bfloat16), b

    w1, b1 = linear(ks[0], ks[1], STATE_SIZE, HIDDEN)
    w2, b2 = linear(ks[2], ks[3], HIDDEN, HIDDEN)
    w3, b3 = linear(ks[4], ks[5], HIDDEN, HIDDEN)
    w4, b4 = linear(ks[6], ks[7], HIDDEN, ACTION_SIZE)
    w4 = jnp.pad(w4, ((0, 0), (0, PADDED_OUT - ACTION_SIZE)))
    b4 = jnp.pad(b4, ((0, 0), (0, PADDED_OUT - ACTION_SIZE)))
    return {"w1": w1, "b1": b1, "w2": w2, "b2": b2,
            "w3": w3, "b3": b3, "w4": w4, "b4": b4}


def reference_forward(x, p):
    """Pure-JAX reference with the same bf16-input / f32-accumulate numerics."""
    f32 = lambda a: a.astype(jnp.float32)
    h = f32(x.astype(jnp.bfloat16))
    h = jnp.maximum(h @ f32(p["w1"]) + p["b1"], 0.0)
    h = f32(h.astype(jnp.bfloat16))
    h = jnp.maximum(h @ f32(p["w2"]) + p["b2"], 0.0)
    h = f32(h.astype(jnp.bfloat16))
    h = jnp.maximum(h @ f32(p["w3"]) + p["b3"], 0.0)
    h = f32(h.astype(jnp.bfloat16))
    return (h @ f32(p["w4"]) + p["b4"])[:, :ACTION_SIZE]


if __name__ == "__main__":
    key = jax.random.PRNGKey(0)
    k_params, k_x = jax.random.split(key)
    params = init_params(k_params)

    # Small-batch path (single 8-row block).
    batch = 8
    x = jax.random.normal(k_x, (batch, STATE_SIZE), jnp.float32)
    out = jax.block_until_ready(qnetwork_forward(x, params))
    ref = reference_forward(x, params)
    assert out.shape == (batch, ACTION_SIZE)
    assert jnp.allclose(out, ref, atol=5e-3, rtol=5e-3), \
        float(jnp.max(jnp.abs(out - ref)))

    # Cheap multi-tile grid path: tile_b=128, batch=200 -> 2 grid steps + padding.
    big_b = 200
    xb = jax.random.normal(jax.random.PRNGKey(1), (big_b, STATE_SIZE), jnp.float32)
    out_big = jax.block_until_ready(qnetwork_forward(xb, params, tile_b=128))
    ref_big = reference_forward(xb, params)
    assert out_big.shape == (big_b, ACTION_SIZE)
    assert jnp.allclose(out_big, ref_big, atol=5e-3, rtol=5e-3), \
        float(jnp.max(jnp.abs(out_big - ref_big)))

    print("KERNEL_OK")
</pallas_src>

<mosaic_0001>
module attributes {stable_mosaic.version = 11 : i64} {
  func.func @qnetwork_kernel(%arg0: i32, %arg1: memref<8x64xbf16, #tpu.memory_space<vmem>>, %arg2: memref<64x64xbf16, #tpu.memory_space<vmem>>, %arg3: memref<1x64xf32, #tpu.memory_space<vmem>>, %arg4: memref<64x64xbf16, #tpu.memory_space<vmem>>, %arg5: memref<1x64xf32, #tpu.memory_space<vmem>>, %arg6: memref<64x64xbf16, #tpu.memory_space<vmem>>, %arg7: memref<1x64xf32, #tpu.memory_space<vmem>>, %arg8: memref<64x128xbf16, #tpu.memory_space<vmem>>, %arg9: memref<1x128xf32, #tpu.memory_space<vmem>>, %arg10: memref<8x128xf32, #tpu.memory_space<vmem>>) attributes {dimension_semantics = [#tpu.dimension_semantics<parallel>], iteration_bounds = array<i64: 1>, scalar_prefetch = 0 : i64, scratch_operands = 0 : i64, tpu.core_type = #tpu.core_type<tc>, window_params = [{transform_indices = @transform_0, window_bounds = array<i64: 8, 64>}, {pipeline_mode = #tpu.pipeline_mode<synchronous>, transform_indices = @transform_1, window_bounds = array<i64: 64, 64>}, {pipeline_mode = #tpu.pipeline_mode<synchronous>, transform_indices = @transform_2, window_bounds = array<i64: 1, 64>}, {pipeline_mode = #tpu.pipeline_mode<synchronous>, transform_indices = @transform_3, window_bounds = array<i64: 64, 64>}, {pipeline_mode = #tpu.pipeline_mode<synchronous>, transform_indices = @transform_4, window_bounds = array<i64: 1, 64>}, {pipeline_mode = #tpu.pipeline_mode<synchronous>, transform_indices = @transform_5, window_bounds = array<i64: 64, 64>}, {pipeline_mode = #tpu.pipeline_mode<synchronous>, transform_indices = @transform_6, window_bounds = array<i64: 1, 64>}, {pipeline_mode = #tpu.pipeline_mode<synchronous>, transform_indices = @transform_7, window_bounds = array<i64: 64, 128>}, {pipeline_mode = #tpu.pipeline_mode<synchronous>, transform_indices = @transform_8, window_bounds = array<i64: 1, 128>}, {transform_indices = @transform_9, window_bounds = array<i64: 8, 128>}]} {
    %c0 = arith.constant 0 : index
    %c0_0 = arith.constant 0 : index
    %0 = vector.load %arg1[%c0, %c0_0] : memref<8x64xbf16, #tpu.memory_space<vmem>>, vector<8x64xbf16>
    %c0_1 = arith.constant 0 : index
    %c0_2 = arith.constant 0 : index
    %1 = vector.load %arg2[%c0_1, %c0_2] : memref<64x64xbf16, #tpu.memory_space<vmem>>, vector<64x64xbf16>
    %cst = arith.constant dense<0.000000e+00> : vector<8x64xf32>
    %2 = tpu.matmul %0, %1, %cst {dimension_numbers = #tpu.dot_dimension_numbers<[1], [0], [0], [1], [0, 0, 1, 1], [], []>} : vector<8x64xbf16>, vector<64x64xbf16>, vector<8x64xf32> -> vector<8x64xf32>
    %c0_3 = arith.constant 0 : index
    %c0_4 = arith.constant 0 : index
    %3 = vector.load %arg3[%c0_3, %c0_4] : memref<1x64xf32, #tpu.memory_space<vmem>>, vector<1x64xf32>
    %4 = vector.broadcast %3 : vector<1x64xf32> to vector<8x64xf32>
    %5 = arith.addf %2, %4 : vector<8x64xf32>
    %cst_5 = arith.constant 0.000000e+00 : f32
    %6 = vector.broadcast %cst_5 : f32 to vector<8x64xf32>
    %7 = arith.maximumf %5, %6 : vector<8x64xf32>
    %8 = arith.truncf %7 : vector<8x64xf32> to vector<8x64xbf16>
    %c0_6 = arith.constant 0 : index
    %c0_7 = arith.constant 0 : index
    %9 = vector.load %arg4[%c0_6, %c0_7] : memref<64x64xbf16, #tpu.memory_space<vmem>>, vector<64x64xbf16>
    %cst_8 = arith.constant dense<0.000000e+00> : vector<8x64xf32>
    %10 = tpu.matmul %8, %9, %cst_8 {dimension_numbers = #tpu.dot_dimension_numbers<[1], [0], [0], [1], [0, 0, 1, 1], [], []>} : vector<8x64xbf16>, vector<64x64xbf16>, vector<8x64xf32> -> vector<8x64xf32>
    %c0_9 = arith.constant 0 : index
    %c0_10 = arith.constant 0 : index
    %11 = vector.load %arg5[%c0_9, %c0_10] : memref<1x64xf32, #tpu.memory_space<vmem>>, vector<1x64xf32>
    %12 = vector.broadcast %11 : vector<1x64xf32> to vector<8x64xf32>
    %13 = arith.addf %10, %12 : vector<8x64xf32>
    %cst_11 = arith.constant 0.000000e+00 : f32
    %14 = vector.broadcast %cst_11 : f32 to vector<8x64xf32>
    %15 = arith.maximumf %13, %14 : vector<8x64xf32>
    %16 = arith.truncf %15 : vector<8x64xf32> to vector<8x64xbf16>
    %c0_12 = arith.constant 0 : index
    %c0_13 = arith.constant 0 : index
    %17 = vector.load %arg6[%c0_12, %c0_13] : memref<64x64xbf16, #tpu.memory_space<vmem>>, vector<64x64xbf16>
    %cst_14 = arith.constant dense<0.000000e+00> : vector<8x64xf32>
    %18 = tpu.matmul %16, %17, %cst_14 {dimension_numbers = #tpu.dot_dimension_numbers<[1], [0], [0], [1], [0, 0, 1, 1], [], []>} : vector<8x64xbf16>, vector<64x64xbf16>, vector<8x64xf32> -> vector<8x64xf32>
    %c0_15 = arith.constant 0 : index
    %c0_16 = arith.constant 0 : index
    %19 = vector.load %arg7[%c0_15, %c0_16] : memref<1x64xf32, #tpu.memory_space<vmem>>, vector<1x64xf32>
    %20 = vector.broadcast %19 : vector<1x64xf32> to vector<8x64xf32>
    %21 = arith.addf %18, %20 : vector<8x64xf32>
    %cst_17 = arith.constant 0.000000e+00 : f32
    %22 = vector.broadcast %cst_17 : f32 to vector<8x64xf32>
    %23 = arith.maximumf %21, %22 : vector<8x64xf32>
    %24 = arith.truncf %23 : vector<8x64xf32> to vector<8x64xbf16>
    %c0_18 = arith.constant 0 : index
    %c0_19 = arith.constant 0 : index
    %25 = vector.load %arg8[%c0_18, %c0_19] : memref<64x128xbf16, #tpu.memory_space<vmem>>, vector<64x128xbf16>
    %cst_20 = arith.constant dense<0.000000e+00> : vector<8x128xf32>
    %26 = tpu.matmul %24, %25, %cst_20 {dimension_numbers = #tpu.dot_dimension_numbers<[1], [0], [0], [1], [0, 0, 1, 1], [], []>} : vector<8x64xbf16>, vector<64x128xbf16>, vector<8x128xf32> -> vector<8x128xf32>
    %c0_21 = arith.constant 0 : index
    %c0_22 = arith.constant 0 : index
    %27 = vector.load %arg9[%c0_21, %c0_22] : memref<1x128xf32, #tpu.memory_space<vmem>>, vector<1x128xf32>
    %28 = vector.broadcast %27 : vector<1x128xf32> to vector<8x128xf32>
    %29 = arith.addf %26, %28 : vector<8x128xf32>
    %c0_23 = arith.constant 0 : index
    %c0_24 = arith.constant 0 : index
    %30 = vector.load %arg10[%c0_23, %c0_24] : memref<8x128xf32, #tpu.memory_space<vmem>>, vector<8x128xf32>
    tpu.vector_store %arg10[%c0_23, %c0_24], %29 {strides = array<i32>} : memref<8x128xf32, #tpu.memory_space<vmem>>, vector<8x128xf32>,
    return
  }
  func.func @transform_0(%arg0: i32) -> (i32, i32) {
    %c0_i32 = arith.constant 0 : i32
    %c0_i32_0 = arith.constant 0 : i32
    return %arg0, %c0_i32 : i32, i32
  }
  func.func @transform_1(%arg0: i32) -> (i32, i32) {
    %c0_i32 = arith.constant 0 : i32
    %c0_i32_0 = arith.constant 0 : i32
    %c0_i32_1 = arith.constant 0 : i32
    return %c0_i32, %c0_i32_0 : i32, i32
  }
  func.func @transform_2(%arg0: i32) -> (i32, i32) {
    %c0_i32 = arith.constant 0 : i32
    %c0_i32_0 = arith.constant 0 : i32
    %c0_i32_1 = arith.constant 0 : i32
    return %c0_i32, %c0_i32_0 : i32, i32
  }
  func.func @transform_3(%arg0: i32) -> (i32, i32) {
    %c0_i32 = arith.constant 0 : i32
    %c0_i32_0 = arith.constant 0 : i32
    %c0_i32_1 = arith.constant 0 : i32
    return %c0_i32, %c0_i32_0 : i32, i32
  }
  func.func @transform_4(%arg0: i32) -> (i32, i32) {
    %c0_i32 = arith.constant 0 : i32
    %c0_i32_0 = arith.constant 0 : i32
    %c0_i32_1 = arith.constant 0 : i32
    return %c0_i32, %c0_i32_0 : i32, i32
  }
  func.func @transform_5(%arg0: i32) -> (i32, i32) {
    %c0_i32 = arith.constant 0 : i32
    %c0_i32_0 = arith.constant 0 : i32
    %c0_i32_1 = arith.constant 0 : i32
    return %c0_i32, %c0_i32_0 : i32, i32
  }
  func.func @transform_6(%arg0: i32) -> (i32, i32) {
    %c0_i32 = arith.constant 0 : i32
    %c0_i32_0 = arith.constant 0 : i32
    %c0_i32_1 = arith.constant 0 : i32
    return %c0_i32, %c0_i32_0 : i32, i32
  }
  func.func @transform_7(%arg0: i32) -> (i32, i32) {
    %c0_i32 = arith.constant 0 : i32
    %c0_i32_0 = arith.constant 0 : i32
    %c0_i32_1 = arith.constant 0 : i32
    return %c0_i32, %c0_i32_0 : i32, i32
  }
  func.func @transform_8(%arg0: i32) -> (i32, i32) {
    %c0_i32 = arith.constant 0 : i32
    %c0_i32_0 = arith.constant 0 : i32
    %c0_i32_1 = arith.constant 0 : i32
    return %c0_i32, %c0_i32_0 : i32, i32
  }
  func.func @transform_9(%arg0: i32) -> (i32, i32) {
    %c0_i32 = arith.constant 0 : i32
    %c0_i32_0 = arith.constant 0 : i32
    return %arg0, %c0_i32 : i32, i32
  }
}

</mosaic_0001>

<bundles_post_ra>
// kernel: tpu_custom_call.1
= control target key start
LH: loop header
LB: loop body
LE: loop exit
PB: predicated region body
PF: predicated region fallthrough
CT: control target
= control target key end

     0   :  { %14 = vsyncpa [#allocation3], 0  ;;  %s896_s0 = inlined_call_operand.hbm [shape: bf16[8,64], index: 0, kind: input, shape index: {}]   ;;  %s897_s1 = inlined_call_operand.hbm [shape: bf16[64,64], index: 1, kind: input, shape index: {}]   ;;  %s898_s2 = inlined_call_operand.vmem [shape: f32[1,64], index: 2, kind: input, shape index: {}]   ;;  %s899_s3 = inlined_call_operand.hbm [shape: bf16[64,64], index: 3, kind: input, shape index: {}]   ;;  %s900_s4 = inlined_call_operand.vmem [shape: f32[1,64], index: 4, kind: input, shape index: {}]   ;;  %s901_s5 = inlined_call_operand.hbm [shape: bf16[64,64], index: 5, kind: input, shape index: {}]   ;;  %s902_s6 = inlined_call_operand.vmem [shape: f32[1,64], index: 6, kind: input, shape index: {}]   ;;  %s903_s7 = inlined_call_operand.hbm [shape: bf16[64,128], index: 7, kind: input, shape index: {}]   ;;  %s904_s8 = inlined_call_operand.vmem [shape: f32[1,128], index: 8, kind: input, shape index: {}]   ;;  %s905_s9 = inlined_call_operand.hbm [shape: f32[8,128], index: 9, kind: output, shape index: {}]  }
   0x1   :  { %15 = vsyncpa [#allocation6], 0 }
   0x2   :  { %16 = vsyncpa [#allocation9], 0 }
   0x3   :  { %17 = vsyncpa [#allocation4], 0  ;;  %s712_s30 = smov [#allocation5]   ;;  %s572_s13 = scalar_lea.hbm %s897_s1, 512 }
   0x4   :  { %s33_s10 = sshll.u32 %s712_s30, 4  ;;  %p573_p0 = scmp.ne.s32.totalorder %s897_s1, %s572_s13  ;;  %s34_s10 = int_to_ptr.vmem [resolvable:$true] %s33_s10 }
   0x5   :  { %p576_p1 = scmp.lt.u32.totalorder %s572_s13, %s897_s1 }
   0x7   :  { %p578_p2 = pnand %p576_p1, %p573_p0 }
   0x9   :  { %581 = shalt.err (!%p578_p2)
}
   0xa   :  { %s582_s18 = scalar_lea.vmem %s34_s10, 512  ;;  %p587_p4 = scmp.lt.s32.totalorder %s34_s10, %s34_s10 }
   0xb   :  { %p583_p3 = scmp.ne.s32.totalorder %s34_s10, %s582_s18  ;;  %p588_p5 = scmp.lt.s32.totalorder %s582_s18, %s582_s18 }
   0xd   :  { %p589_p6 = por %p588_p5, %p587_p4 }
   0xf   :  { %p590_p7 = pnand %p589_p6, %p583_p3 }
  0x11   :  { %593 = shalt.err (!%p590_p7)
}
  0x12   :  { %s713_s19 = smov 64   ;;  %s714_s20 = smov 4  }
  0x13   :  { %39 = dma.hbm_to_vmem [thread:$0]  %s897_s1, 512, %s34_s10, [#allocation6], %s713_s19, %s713_s19, %s714_s20  }
  0x14   :  { %s715_s23 = smov [#allocation8]   ;;  %s716_s25 = smov [#allocation2]  }
  0x15   :  { %s61_s24 = sshll.u32 %s715_s23, 4  ;;  %s24_s26 = sshll.u32 %s716_s25, 4  ;;  %s62_s24 = int_to_ptr.vmem [resolvable:$true] %s61_s24  ;;  %s25_s26 = int_to_ptr.vmem [resolvable:$true] %s24_s26 }
  0x16   :  { %s594_s29 = scalar_lea.hbm %s901_s5, 512 }
  0x17   :  { %p595_p8 = scmp.ne.s32.totalorder %s901_s5, %s594_s29  ;;  %p598_p9 = scmp.lt.u32.totalorder %s594_s29, %s901_s5 }
  0x19   :  { %p600_p10 = pnand %p598_p9, %p595_p8 }
  0x1b   :  { %603 = shalt.err (!%p600_p10)
}
  0x1c   :  { %s604_s1 = scalar_lea.vmem %s62_s24, 512  ;;  %p609_p12 = scmp.lt.s32.totalorder %s62_s24, %s62_s24 }
  0x1d   :  { %p605_p11 = scmp.ne.s32.totalorder %s62_s24, %s604_s1  ;;  %p610_p13 = scmp.lt.s32.totalorder %s604_s1, %s604_s1 }
  0x1f   :  { %p611_p0 = por %p610_p13, %p609_p12 }
  0x21   :  { %p612_p1 = pnand %p611_p0, %p605_p11 }
  0x23   :  { %615 = shalt.err (!%p612_p1)
}
  0x24   :  { %67 = dma.hbm_to_vmem [thread:$0]  %s901_s5, 512, %s62_s24, [#allocation9], %s713_s19, %s713_s19, %s714_s20  }
  0x25   :  { %s616_s17 = scalar_lea.hbm %s896_s0, 64 }
  0x26   :  { %p617_p2 = scmp.ne.s32.totalorder %s896_s0, %s616_s17  ;;  %p620_p3 = scmp.lt.u32.totalorder %s616_s17, %s896_s0 }
  0x28   :  { %p622_p4 = pnand %p620_p3, %p617_p2 }
  0x2a   :  { %625 = shalt.err (!%p622_p4)
}
  0x2b   :  { %s626_s25 = scalar_lea.vmem %s25_s26, 64  ;;  %p631_p6 = scmp.lt.s32.totalorder %s25_s26, %s25_s26 }
  0x2c   :  { %p627_p5 = scmp.ne.s32.totalorder %s25_s26, %s626_s25  ;;  %p632_p7 = scmp.lt.s32.totalorder %s626_s25, %s626_s25 }
  0x2e   :  { %p633_p8 = por %p632_p7, %p631_p6 }
  0x30   :  { %p634_p9 = pnand %p633_p8, %p627_p5 }
  0x32   :  { %637 = shalt.err (!%p634_p9)
}
  0x33   :  { %27 = dma.hbm_to_vmem [thread:$0]  %s896_s0, 64, %s25_s26, [#allocation3]  }
  0x34   :  { %s717_s27 = smov [#allocation7]   ;;  %s718_s29 = smov [#allocation10]  }
  0x35   :  { %s47_s28 = sshll.u32 %s717_s27, 4  ;;  %s75_s30 = sshll.u32 %s718_s29, 4  ;;  %s48_s28 = int_to_ptr.vmem [resolvable:$true] %s47_s28  ;;  %s76_s30 = int_to_ptr.vmem [resolvable:$true] %s75_s30 }
  0x36   :  { %s638_s13 = scalar_lea.hbm %s899_s3, 512 }
  0x37   :  { %p639_p10 = scmp.ne.s32.totalorder %s899_s3, %s638_s13  ;;  %p642_p11 = scmp.lt.u32.totalorder %s638_s13, %s899_s3 }
  0x39   :  { %p644_p12 = pnand %p642_p11, %p639_p10 }
  0x3b   :  { %647 = shalt.err (!%p644_p12)
}
  0x3c   :  { %s648_s0 = scalar_lea.vmem %s48_s28, 512  ;;  %p653_p0 = scmp.lt.s32.totalorder %s48_s28, %s48_s28 }
  0x3d   :  { %p649_p13 = scmp.ne.s32.totalorder %s48_s28, %s648_s0  ;;  %p654_p1 = scmp.lt.s32.totalorder %s648_s0, %s648_s0 }
  0x3f   :  { %p655_p2 = por %p654_p1, %p653_p0 }
  0x41   :  { %p656_p3 = pnand %p655_p2, %p649_p13 }
  0x43   :  { %659 = shalt.err (!%p656_p3)
}
  0x44   :  { %53 = dma.hbm_to_vmem [thread:$0]  %s899_s3, 512, %s48_s28, [#allocation6], %s713_s19, %s713_s19, %s714_s20  }
  0x45   :  { %s660_s21 = scalar_lea.hbm %s903_s7, 512 }
  0x46   :  { %p661_p4 = scmp.ne.s32.totalorder %s903_s7, %s660_s21  ;;  %p664_p5 = scmp.lt.u32.totalorder %s660_s21, %s903_s7 }
  0x48   :  { %p666_p6 = pnand %p664_p5, %p661_p4 }
  0x4a   :  { %669 = shalt.err (!%p666_p6)
}
  0x4b   :  { %s670_s24 = scalar_lea.vmem %s76_s30, 512  ;;  %p675_p8 = scmp.lt.s32.totalorder %s76_s30, %s76_s30 }
  0x4c   :  { %p671_p7 = scmp.ne.s32.totalorder %s76_s30, %s670_s24  ;;  %p676_p9 = scmp.lt.s32.totalorder %s670_s24, %s670_s24 }
  0x4e   :  { %p677_p10 = por %p676_p9, %p675_p8 }
  0x50   :  { %p678_p11 = pnand %p677_p10, %p671_p7 }
  0x52   :  { %681 = shalt.err (!%p678_p11)
}
  0x53   :  { %81 = dma.hbm_to_vmem [thread:$0]  %s903_s7, 512, %s76_s30, [#allocation9], %s713_s19, %s713_s19, %s714_s20  }
  0x54   :  { %704 = dma.done.wait [#allocation3], 64  }
  0x55   :  { %705 = vsyncadd [#allocation3], 4294967232 }
  0x56   :  { %706 = dma.done.wait [#allocation6], 1024  }
  0x57   :  { %707 = vsyncadd [#allocation6], 4294966272 }
  0x58   :  { %708 = dma.done.wait [#allocation9], 1024  }
  0x59   :  { %709 = vsyncadd [#allocation9], 4294966272  ;;  %v719_v0 = vmov 0.0   ;;  %vm720_vm0 = vmmov 0   ;;  %v556_v1 = vld [vmem:[#allocation5] sm:$0xff]   ;;  %v557_v2 = vld [vmem:[#allocation5 + $0x8] sm:$0xff]  }
  0x5a   :  { %498 = vmatprep.subr.bf16.mxu0 %v719_v0  ;;  %506 = vmatprep.mubr.msk.bf16.mxu0 %vm720_vm0, %v719_v0  ;;  %v560_v3 = vld [vmem:[#allocation7] sm:$0xff]   ;;  %v558_v4 = vld [vmem:[#allocation5 + $0x10] sm:$0xff]   ;;  %v561_v5 = vld [vmem:[#allocation7 + $0x8] sm:$0xff]   ;;  %vm140_vm1 = vcmask 523264   ;;  %s721_s11 = smov [#allocation11]  }
  0x5b   :  { %510 = vmatprep.subr.bf16.mxu1 %v719_v0  ;;  %518 = vmatprep.mubr.msk.bf16.mxu1 %vm720_vm0, %v719_v0  ;;  %v559_v6 = vld [vmem:[#allocation5 + $0x18] sm:$0xff]   ;;  %v562_v8 = vld [vmem:[#allocation7 + $0x10] sm:$0xff]   ;;  %v564_v10 = vld [vmem:[#allocation8] sm:$0xff]   ;;  %s443_s12 = sshll.u32 %s721_s11, 4  ;;  %s444_s12 = int_to_ptr.vmem [resolvable:$true] %s443_s12 }
  0x5c   :  { %499 = vmatpush3.bf16.msra.mxu0 %v556_v1  ;;  %511 = vmatpush3.bf16.msra.mxu1 %v560_v3  ;;  %v100_v7 = vld [vmem:[#allocation2] sm:$0xf]  ;;  %v565_v11 = vld [vmem:[#allocation8 + $0x8] sm:$0xff]   ;;  %v566_v20 = vld [vmem:[#allocation8 + $0x10] sm:$0xff]   ;;  %p687_p13 = scmp.lt.s32.totalorder %s444_s12, %s444_s12 }
  0x5d   :  { %500 = vmatprep.subr.bf16.mxu0 %v719_v0  ;;  %512 = vmatprep.subr.bf16.mxu1 %v719_v0  ;;  %v563_v9 = vld [vmem:[#allocation7 + $0x18] sm:$0xff]   ;;  %v568_v22 = vld [vmem:[#allocation10] sm:$0xff]   ;;  %v569_v23 = vld [vmem:[#allocation10 + $0x8] sm:$0xff]  }
  0x5e   :  { %v454_v12 = vld [vmem:[%s898_s2] ss:$0 sm:$0xff]  ;;  %v570_v32 = vld [vmem:[#allocation10 + $0x10] sm:$0xff]  }
  0x5f   :  { %v567_v21 = vld [vmem:[#allocation8 + $0x18] sm:$0xff]  }
  0x60   :  { %501 = vmatpush3.bf16.msra.mxu0 %v557_v2  ;;  %513 = vmatpush3.bf16.msra.mxu1 %v561_v5  ;;  %v460_v24 = vld [vmem:[%s900_s4] ss:$0 sm:$0xff] }
  0x61   :  { %502 = vmatprep.subr.bf16.mxu0 %v719_v0  ;;  %514 = vmatprep.subr.bf16.mxu1 %v719_v0  ;;  %v571_v33 = vld [vmem:[#allocation10 + $0x18] sm:$0xff]  }
  0x62   :  { %v466_v34 = vld [vmem:[%s902_s6] ss:$0 sm:$0xff]  ;;  %s682_s6 = scalar_lea.vmem %s444_s12, 128 }
  0x63   :  { %v472_v42 = vld [vmem:[%s904_s8] ss:$0 sm:$0xff]  ;;  %p683_p12 = scmp.ne.s32.totalorder %s444_s12, %s682_s6  ;;  %p688_p0 = scmp.lt.s32.totalorder %s682_s6, %s682_s6 }
  0x64   :  { %503 = vmatpush3.bf16.msra.mxu0 %v558_v4  ;;  %515 = vmatpush3.bf16.msra.mxu1 %v562_v8 }
  0x65   :  { %504 = vmatprep.subr.bf16.mxu0 %v719_v0  ;;  %516 = vmatprep.subr.bf16.mxu1 %v719_v0  ;;  %p689_p1 = por %p688_p0, %p687_p13 }
  0x67   :  { %p690_p2 = pnand %p689_p1, %p683_p12 }
  0x68   :  { %505 = vmatpush3.bf16.msra.mxu0 %v559_v6  ;;  %517 = vmatpush3.bf16.msra.mxu1 %v563_v9 }
  0x69   :  { %522 = vmatprep.subr.bf16.mxu0 %v719_v0  ;;  %534 = vmatprep.subr.bf16.mxu1 %v719_v0 }
  0x6b   :  { %507 = vmatmul.mubr.msk.bf16.vlgmr.msra.gmra.mrb[0].mxu0 %vm140_vm1, %v100_v7 }
  0x6c   :  { %530 = vmatprep.mubr.msk.bf16.mxu0 %vm720_vm0, %v719_v0  ;;  %523 = vmatpush3.bf16.msra.mxu0 %v564_v10 }
  0x6d   :  { %524 = vmatprep.subr.bf16.mxu0 %v719_v0 }
  0x70   :  { %525 = vmatpush3.bf16.msra.mxu0 %v565_v11 }
  0x71   :  { %526 = vmatprep.subr.bf16.mxu0 %v719_v0 }
  0x74   :  { %527 = vmatpush3.bf16.msra.mxu0 %v566_v20 }
  0x75   :  { %528 = vmatprep.subr.bf16.mxu0 %v719_v0 }
  0x78   :  { %529 = vmatpush3.bf16.msra.mxu0 %v567_v21 }
 0x13e   :  { %v178_v13 = vpop.f32.mrb[0].mxu0 }
 0x13f   :  { %v179_v14 = vadd.f32 %v454_v12, %v178_v13  ;;  %v508_v15 = vpop.f32.mrb[1].mxu0 }
 0x140   :  { %v181_v16 = vpop.f32.mrb[2].mxu0 }
 0x141   :  { %v184_v17 = vmax.f32 %v179_v14, 0.0  ;;  %v509_v18 = vpop.f32.mrb[3].mxu0 }
 0x143   :  { %v185_v19 = vpack.c.bf16 %v184_v17, %v184_v17 }
 0x145   :  { %519 = vmatmul.mubr.msk.bf16.vlgmr.msra.gmra.mrb[0].mxu1 %vm140_vm1, %v185_v19 }
 0x146   :  { %542 = vmatprep.mubr.msk.bf16.mxu1 %vm720_vm0, %v719_v0  ;;  %535 = vmatpush3.bf16.msra.mxu1 %v568_v22 }
 0x147   :  { %536 = vmatprep.subr.bf16.mxu1 %v719_v0 }
 0x14a   :  { %537 = vmatpush3.bf16.msra.mxu1 %v569_v23 }
 0x14b   :  { %538 = vmatprep.subr.bf16.mxu1 %v719_v0 }
 0x14e   :  { %539 = vmatpush3.bf16.msra.mxu1 %v570_v32 }
 0x14f   :  { %540 = vmatprep.subr.bf16.mxu1 %v719_v0 }
 0x152   :  { %541 = vmatpush3.bf16.msra.mxu1 %v571_v33 }
 0x218   :  { %v262_v25 = vpop.f32.mrb[0].mxu1 }
 0x219   :  { %v263_v26 = vadd.f32 %v460_v24, %v262_v25  ;;  %v520_v27 = vpop.f32.mrb[1].mxu1 }
 0x21a   :  { %v265_v28 = vpop.f32.mrb[2].mxu1 }
 0x21b   :  { %v268_v29 = vmax.f32 %v263_v26, 0.0  ;;  %v521_v30 = vpop.f32.mrb[3].mxu1 }
 0x21d   :  { %v269_v31 = vpack.c.bf16 %v268_v29, %v268_v29 }
 0x21f   :  { %531 = vmatmul.mubr.msk.bf16.vlgmr.msra.gmra.mrb[4].mxu0 %vm140_vm1, %v269_v31 }
 0x2f2   :  { %v346_v35 = vpop.f32.mrb[4].mxu0 }
 0x2f3   :  { %v347_v36 = vadd.f32 %v466_v34, %v346_v35  ;;  %v532_v37 = vpop.f32.mrb[5].mxu0 }
 0x2f4   :  { %v349_v38 = vpop.f32.mrb[6].mxu0 }
 0x2f5   :  { %v352_v39 = vmax.f32 %v347_v36, 0.0  ;;  %v533_v40 = vpop.f32.mrb[7].mxu0 }
 0x2f7   :  { %v353_v41 = vpack.c.bf16 %v352_v39, %v352_v39 }
 0x2f9   :  { %543 = vmatmul.mubr.msk.bf16.vlgmr.msra.gmra.mrb[4].mxu1 %vm140_vm1, %v353_v41 }
 0x3cc   :  { %v430_v43 = vpop.f32.mrb[4].mxu1 }
 0x3cd   :  { %v431_v44 = vadd.f32 %v472_v42, %v430_v43  ;;  %v544_v45 = vpop.f32.mrb[5].mxu1 }
 0x3ce   :  { %v433_v46 = vpop.f32.mrb[6].mxu1 }
 0x3cf   :  { %436 = vst [vmem:[#allocation11] sm:$0xff] %v431_v44  ;;  %v545_v47 = vpop.f32.mrb[7].mxu1 }
 0x3d0   :  { %693 = shalt.err (!%p690_p2)
}
 0x3d1   :  { %s694_s8 = scalar_lea.hbm %s905_s9, 128 }
 0x3d2   :  { %p695_p3 = scmp.ne.s32.totalorder %s905_s9, %s694_s8  ;;  %p698_p4 = scmp.lt.u32.totalorder %s694_s8, %s905_s9 }
 0x3d4   :  { %p700_p5 = pnand %p698_p4, %p695_p3 }
 0x3d6   :  { %703 = shalt.err (!%p700_p5)
}
 0x3d7   :  { %446 = dma.vmem_to_hbm [thread:$0]  %s444_s12, 128, %s905_s9, [#allocation4]  }
 0x3d8   :  { %710 = dma.done.wait [#allocation4], 128  }
 0x3d9   :  { %711 = vsyncadd [#allocation4], 4294967168 }
 0x3da   :  { %450 = vsyncpa [#allocation3], 1 }
 0x3db   :  { %451 = vsyncpa [#allocation6], 1 }
 0x3dc   :  { %452 = vsyncpa [#allocation9], 1 }
 0x3dd   :  { %453 = vsyncpa [#allocation4], 1 }

</bundles_post_ra>
